<compile_context>
chip_gen: v7x
topology: tpu7x:2x2x1
jax: 0.10.0
libtpu: 0.0.40
codegen_flags: <defaults>
</compile_context>

<pallas_src>
import jax
import jax.numpy as jnp
from jax.experimental import pallas as pl
from jax.experimental.pallas import tpu as pltpu

EPS = 1e-5
NPAD = 128          # padded fc4 output width (true width = 2) -> lane-dense stores
CAP_TILE_B = 1024   # max batch tile; ~8 MiB working set, safe on v5e's 16 MiB default


def _round_up(n, m):
    return ((n + m - 1) // m) * m


# ---------------------------------------------------------------------------
# Kernel: 4 x (MXU matmul + bias + ReLU), BN already folded into w/b.
# ---------------------------------------------------------------------------
def urlcnn_kernel(x_ref,
                  w1_ref, b1_ref,
                  w2_ref, b2_ref,
                  w3_ref, b3_ref,
                  w4_ref, b4_ref,
                  out_ref):
    x = x_ref[...].astype(jnp.bfloat16)           # cast in-kernel (x arrives f32)

    h = jnp.dot(x, w1_ref[...], preferred_element_type=jnp.float32) + b1_ref[...]
    h = jnp.maximum(h, 0.0)

    h = jnp.dot(h.astype(jnp.bfloat16), w2_ref[...],
                preferred_element_type=jnp.float32) + b2_ref[...]
    h = jnp.maximum(h, 0.0)

    h = jnp.dot(h.astype(jnp.bfloat16), w3_ref[...],
                preferred_element_type=jnp.float32) + b3_ref[...]
    h = jnp.maximum(h, 0.0)

    y = jnp.dot(h.astype(jnp.bfloat16), w4_ref[...],
                preferred_element_type=jnp.float32) + b4_ref[...]
    out_ref[...] = y.astype(out_ref.dtype)        # bf16 writeback (only 2 real cols)


# ---------------------------------------------------------------------------
# One-time parameter preparation (BN fold, fc4 padding, bf16 cast)
# ---------------------------------------------------------------------------
def prepare_params(params):
    (w1, b1, g1, be1, rm1, rv1,
     w2, b2, g2, be2, rm2, rv2,
     w3, b3, w4, b4) = params

    # Fold BatchNorm1d (eval mode) per-feature affine into weights + bias.
    s1 = g1 / jnp.sqrt(rv1 + EPS)
    t1 = be1 - rm1 * s1
    s2 = g2 / jnp.sqrt(rv2 + EPS)
    t2 = be2 - rm2 * s2

    w1f = w1 * s1[None, :]
    b1f = b1 * s1 + t1
    w2f = w2 * s2[None, :]
    b2f = b2 * s2 + t2

    # Pad fc4 to NPAD output columns (zeros) so the kernel output is lane-dense.
    w4p = jnp.zeros((w4.shape[0], NPAD), jnp.float32).at[:, :2].set(w4)
    b4p = jnp.zeros((NPAD,), jnp.float32).at[:2].set(b4)

    bf16 = lambda a: a.astype(jnp.bfloat16)
    row = lambda v: v.reshape(1, -1).astype(jnp.float32)   # f32 bias rows

    return (bf16(w1f), row(b1f),
            bf16(w2f), row(b2f),
            bf16(w3),  row(b3),
            bf16(w4p), row(b4p))


# ---------------------------------------------------------------------------
# Forward wrapper
# ---------------------------------------------------------------------------
@jax.jit
def urlcnn_forward(x, prepped):
    """x: (B, input_size) float32. prepped: output of prepare_params.
    Returns (B, 2) float32 logits."""
    B, input_size = x.shape

    # >=2 grid steps (even count) for v7x megacore + DMA/compute pipelining,
    # capped so the per-tile working set stays well inside VMEM on every gen.
    n_steps = max(2, 2 * pl.cdiv(B, 2 * CAP_TILE_B))
    tile_b = min(CAP_TILE_B, _round_up(pl.cdiv(B, n_steps), 16))
    bp = _round_up(B, tile_b)

    # Pad only the batch dim (f32, feature dim untouched; cast happens in-kernel).
    xp = x if bp == B else jnp.pad(x, ((0, bp - B), (0, 0)))

    (w1, b1, w2, b2, w3, b3, w4, b4) = prepped

    resident = lambda a: pl.BlockSpec(a.shape, lambda i: (0, 0))

    out_padded = pl.pallas_call(
        urlcnn_kernel,
        out_shape=jax.ShapeDtypeStruct((bp, NPAD), jnp.bfloat16),
        grid=(bp // tile_b,),
        in_specs=[
            # x block: last dim == full array dim, so no 128-lane padding needed.
            pl.BlockSpec((tile_b, input_size), lambda i: (i, 0)),
            resident(w1), resident(b1),
            resident(w2), resident(b2),
            resident(w3), resident(b3),
            resident(w4), resident(b4),
        ],
        out_specs=pl.BlockSpec((tile_b, NPAD), lambda i: (i, 0)),
        compiler_params=pltpu.CompilerParams(
            dimension_semantics=("parallel",),
            vmem_limit_bytes=32 * 1024 * 1024),
    )(xp, w1, b1, w2, b2, w3, b3, w4, b4)

    return out_padded[:B, :2].astype(jnp.float32)


# ---------------------------------------------------------------------------
# Pure-JAX reference (f32, matches the PyTorch module semantics, eval mode)
# ---------------------------------------------------------------------------
def reference_forward(x, params):
    (w1, b1, g1, be1, rm1, rv1,
     w2, b2, g2, be2, rm2, rv2,
     w3, b3, w4, b4) = params
    h = x @ w1 + b1
    h = (h - rm1) / jnp.sqrt(rv1 + EPS) * g1 + be1
    h = jnp.maximum(h, 0.0)
    h = h @ w2 + b2
    h = (h - rm2) / jnp.sqrt(rv2 + EPS) * g2 + be2
    h = jnp.maximum(h, 0.0)
    h = jnp.maximum(h @ w3 + b3, 0.0)
    return h @ w4 + b4


# ---------------------------------------------------------------------------
# Params
# ---------------------------------------------------------------------------
def init_params(key, input_size):
    ks = jax.random.split(key, 16)
    scale = lambda fan_in: 1.0 / jnp.sqrt(jnp.float32(fan_in))
    w1 = jax.random.normal(ks[0], (input_size, 512), jnp.float32) * scale(input_size)
    b1 = jax.random.normal(ks[1], (512,), jnp.float32) * 0.01
    g1 = 1.0 + 0.1 * jax.random.normal(ks[2], (512,), jnp.float32)
    be1 = 0.1 * jax.random.normal(ks[3], (512,), jnp.float32)
    rm1 = 0.05 * jax.random.normal(ks[4], (512,), jnp.float32)
    rv1 = 1.0 + 0.1 * jnp.abs(jax.random.normal(ks[5], (512,), jnp.float32))

    w2 = jax.random.normal(ks[6], (512, 256), jnp.float32) * scale(512)
    b2 = jax.random.normal(ks[7], (256,), jnp.float32) * 0.01
    g2 = 1.0 + 0.1 * jax.random.normal(ks[8], (256,), jnp.float32)
    be2 = 0.1 * jax.random.normal(ks[9], (256,), jnp.float32)
    rm2 = 0.05 * jax.random.normal(ks[10], (256,), jnp.float32)
    rv2 = 1.0 + 0.1 * jnp.abs(jax.random.normal(ks[11], (256,), jnp.float32))

    w3 = jax.random.normal(ks[12], (256, 128), jnp.float32) * scale(256)
    b3 = jax.random.normal(ks[13], (128,), jnp.float32) * 0.01
    w4 = jax.random.normal(ks[14], (128, 2), jnp.float32) * scale(128)
    b4 = jax.random.normal(ks[15], (2,), jnp.float32) * 0.01

    return (w1, b1, g1, be1, rm1, rv1,
            w2, b2, g2, be2, rm2, rv2,
            w3, b3, w4, b4)


if __name__ == "__main__":
    key = jax.random.PRNGKey(0)
    k_x, k_p = jax.random.split(key)

    B, INPUT_SIZE = 8, 64
    x = jax.random.normal(k_x, (B, INPUT_SIZE), jnp.float32)
    params = init_params(k_p, INPUT_SIZE)

    # One-time param prep (BN fold, fc4 padding, bf16 cast) — hoisted out of forward.
    prepped = jax.tree_util.tree_map(jax.block_until_ready, prepare_params(params))

    out = urlcnn_forward(x, prepped)
    out = jax.block_until_ready(out)

    ref = reference_forward(x, params)
    assert out.shape == (B, 2)
    # bf16 matmul operands / bf16 writeback with f32 accumulation -> looser tol.
    assert jnp.allclose(out, ref, atol=5e-2, rtol=5e-2), "mismatch vs JAX reference"

    print("KERNEL_OK")
</pallas_src>

<mosaic_0001>
module attributes {stable_mosaic.version = 11 : i64} {
  func.func @urlcnn_kernel(%arg0: i32, %arg1: memref<16x64xf32, #tpu.memory_space<vmem>>, %arg2: memref<64x512xbf16, #tpu.memory_space<vmem>>, %arg3: memref<1x512xf32, #tpu.memory_space<vmem>>, %arg4: memref<512x256xbf16, #tpu.memory_space<vmem>>, %arg5: memref<1x256xf32, #tpu.memory_space<vmem>>, %arg6: memref<256x128xbf16, #tpu.memory_space<vmem>>, %arg7: memref<1x128xf32, #tpu.memory_space<vmem>>, %arg8: memref<128x128xbf16, #tpu.memory_space<vmem>>, %arg9: memref<1x128xf32, #tpu.memory_space<vmem>>, %arg10: memref<16x128xbf16, #tpu.memory_space<vmem>>) attributes {dimension_semantics = [#tpu.dimension_semantics<parallel>], iteration_bounds = array<i64: 1>, scalar_prefetch = 0 : i64, scratch_operands = 0 : i64, tpu.core_type = #tpu.core_type<tc>, window_params = [{transform_indices = @transform_0, window_bounds = array<i64: 16, 64>}, {pipeline_mode = #tpu.pipeline_mode<synchronous>, transform_indices = @transform_1, window_bounds = array<i64: 64, 512>}, {pipeline_mode = #tpu.pipeline_mode<synchronous>, transform_indices = @transform_2, window_bounds = array<i64: 1, 512>}, {pipeline_mode = #tpu.pipeline_mode<synchronous>, transform_indices = @transform_3, window_bounds = array<i64: 512, 256>}, {pipeline_mode = #tpu.pipeline_mode<synchronous>, transform_indices = @transform_4, window_bounds = array<i64: 1, 256>}, {pipeline_mode = #tpu.pipeline_mode<synchronous>, transform_indices = @transform_5, window_bounds = array<i64: 256, 128>}, {pipeline_mode = #tpu.pipeline_mode<synchronous>, transform_indices = @transform_6, window_bounds = array<i64: 1, 128>}, {pipeline_mode = #tpu.pipeline_mode<synchronous>, transform_indices = @transform_7, window_bounds = array<i64: 128, 128>}, {pipeline_mode = #tpu.pipeline_mode<synchronous>, transform_indices = @transform_8, window_bounds = array<i64: 1, 128>}, {transform_indices = @transform_9, window_bounds = array<i64: 16, 128>}]} {
    %c0 = arith.constant 0 : index
    %c0_0 = arith.constant 0 : index
    %0 = vector.load %arg1[%c0, %c0_0] : memref<16x64xf32, #tpu.memory_space<vmem>>, vector<16x64xf32>
    %1 = arith.truncf %0 : vector<16x64xf32> to vector<16x64xbf16>
    %c0_1 = arith.constant 0 : index
    %c0_2 = arith.constant 0 : index
    %2 = vector.load %arg2[%c0_1, %c0_2] : memref<64x512xbf16, #tpu.memory_space<vmem>>, vector<64x512xbf16>
    %cst = arith.constant dense<0.000000e+00> : vector<16x512xf32>
    %3 = tpu.matmul %1, %2, %cst {dimension_numbers = #tpu.dot_dimension_numbers<[1], [0], [0], [1], [0, 0, 1, 1], [], []>} : vector<16x64xbf16>, vector<64x512xbf16>, vector<16x512xf32> -> vector<16x512xf32>
    %c0_3 = arith.constant 0 : index
    %c0_4 = arith.constant 0 : index
    %4 = vector.load %arg3[%c0_3, %c0_4] : memref<1x512xf32, #tpu.memory_space<vmem>>, vector<1x512xf32>
    %5 = vector.broadcast %4 : vector<1x512xf32> to vector<16x512xf32>
    %6 = arith.addf %3, %5 : vector<16x512xf32>
    %cst_5 = arith.constant 0.000000e+00 : f32
    %7 = vector.broadcast %cst_5 : f32 to vector<16x512xf32>
    %8 = arith.maximumf %6, %7 : vector<16x512xf32>
    %9 = arith.truncf %8 : vector<16x512xf32> to vector<16x512xbf16>
    %c0_6 = arith.constant 0 : index
    %c0_7 = arith.constant 0 : index
    %10 = vector.load %arg4[%c0_6, %c0_7] : memref<512x256xbf16, #tpu.memory_space<vmem>>, vector<512x256xbf16>
    %cst_8 = arith.constant dense<0.000000e+00> : vector<16x256xf32>
    %11 = tpu.matmul %9, %10, %cst_8 {dimension_numbers = #tpu.dot_dimension_numbers<[1], [0], [0], [1], [0, 0, 1, 1], [], []>} : vector<16x512xbf16>, vector<512x256xbf16>, vector<16x256xf32> -> vector<16x256xf32>
    %c0_9 = arith.constant 0 : index
    %c0_10 = arith.constant 0 : index
    %12 = vector.load %arg5[%c0_9, %c0_10] : memref<1x256xf32, #tpu.memory_space<vmem>>, vector<1x256xf32>
    %13 = vector.broadcast %12 : vector<1x256xf32> to vector<16x256xf32>
    %14 = arith.addf %11, %13 : vector<16x256xf32>
    %cst_11 = arith.constant 0.000000e+00 : f32
    %15 = vector.broadcast %cst_11 : f32 to vector<16x256xf32>
    %16 = arith.maximumf %14, %15 : vector<16x256xf32>
    %17 = arith.truncf %16 : vector<16x256xf32> to vector<16x256xbf16>
    %c0_12 = arith.constant 0 : index
    %c0_13 = arith.constant 0 : index
    %18 = vector.load %arg6[%c0_12, %c0_13] : memref<256x128xbf16, #tpu.memory_space<vmem>>, vector<256x128xbf16>
    %cst_14 = arith.constant dense<0.000000e+00> : vector<16x128xf32>
    %19 = tpu.matmul %17, %18, %cst_14 {dimension_numbers = #tpu.dot_dimension_numbers<[1], [0], [0], [1], [0, 0, 1, 1], [], []>} : vector<16x256xbf16>, vector<256x128xbf16>, vector<16x128xf32> -> vector<16x128xf32>
    %c0_15 = arith.constant 0 : index
    %c0_16 = arith.constant 0 : index
    %20 = vector.load %arg7[%c0_15, %c0_16] : memref<1x128xf32, #tpu.memory_space<vmem>>, vector<1x128xf32>
    %21 = vector.broadcast %20 : vector<1x128xf32> to vector<16x128xf32>
    %22 = arith.addf %19, %21 : vector<16x128xf32>
    %cst_17 = arith.constant 0.000000e+00 : f32
    %23 = vector.broadcast %cst_17 : f32 to vector<16x128xf32>
    %24 = arith.maximumf %22, %23 : vector<16x128xf32>
    %25 = arith.truncf %24 : vector<16x128xf32> to vector<16x128xbf16>
    %c0_18 = arith.constant 0 : index
    %c0_19 = arith.constant 0 : index
    %26 = vector.load %arg8[%c0_18, %c0_19] : memref<128x128xbf16, #tpu.memory_space<vmem>>, vector<128x128xbf16>
    %cst_20 = arith.constant dense<0.000000e+00> : vector<16x128xf32>
    %27 = tpu.matmul %25, %26, %cst_20 {dimension_numbers = #tpu.dot_dimension_numbers<[1], [0], [0], [1], [0, 0, 1, 1], [], []>} : vector<16x128xbf16>, vector<128x128xbf16>, vector<16x128xf32> -> vector<16x128xf32>
    %c0_21 = arith.constant 0 : index
    %c0_22 = arith.constant 0 : index
    %28 = vector.load %arg9[%c0_21, %c0_22] : memref<1x128xf32, #tpu.memory_space<vmem>>, vector<1x128xf32>
    %29 = vector.broadcast %28 : vector<1x128xf32> to vector<16x128xf32>
    %30 = arith.addf %27, %29 : vector<16x128xf32>
    %31 = arith.truncf %30 : vector<16x128xf32> to vector<16x128xbf16>
    %c0_23 = arith.constant 0 : index
    %c0_24 = arith.constant 0 : index
    %32 = vector.load %arg10[%c0_23, %c0_24] : memref<16x128xbf16, #tpu.memory_space<vmem>>, vector<16x128xbf16>
    tpu.vector_store %arg10[%c0_23, %c0_24], %31 {strides = array<i32>} : memref<16x128xbf16, #tpu.memory_space<vmem>>, vector<16x128xbf16>,
    return
  }
  func.func @transform_0(%arg0: i32) -> (i32, i32) {
    %c0_i32 = arith.constant 0 : i32
    %c0_i32_0 = arith.constant 0 : i32
    return %arg0, %c0_i32 : i32, i32
  }
  func.func @transform_1(%arg0: i32) -> (i32, i32) {
    %c0_i32 = arith.constant 0 : i32
    %c0_i32_0 = arith.constant 0 : i32
    %c0_i32_1 = arith.constant 0 : i32
    return %c0_i32, %c0_i32_0 : i32, i32
  }
  func.func @transform_2(%arg0: i32) -> (i32, i32) {
    %c0_i32 = arith.constant 0 : i32
    %c0_i32_0 = arith.constant 0 : i32
    %c0_i32_1 = arith.constant 0 : i32
    return %c0_i32, %c0_i32_0 : i32, i32
  }
  func.func @transform_3(%arg0: i32) -> (i32, i32) {
    %c0_i32 = arith.constant 0 : i32
    %c0_i32_0 = arith.constant 0 : i32
    %c0_i32_1 = arith.constant 0 : i32
    return %c0_i32, %c0_i32_0 : i32, i32
  }
  func.func @transform_4(%arg0: i32) -> (i32, i32) {
    %c0_i32 = arith.constant 0 : i32
    %c0_i32_0 = arith.constant 0 : i32
    %c0_i32_1 = arith.constant 0 : i32
    return %c0_i32, %c0_i32_0 : i32, i32
  }
  func.func @transform_5(%arg0: i32) -> (i32, i32) {
    %c0_i32 = arith.constant 0 : i32
    %c0_i32_0 = arith.constant 0 : i32
    %c0_i32_1 = arith.constant 0 : i32
    return %c0_i32, %c0_i32_0 : i32, i32
  }
  func.func @transform_6(%arg0: i32) -> (i32, i32) {
    %c0_i32 = arith.constant 0 : i32
    %c0_i32_0 = arith.constant 0 : i32
    %c0_i32_1 = arith.constant 0 : i32
    return %c0_i32, %c0_i32_0 : i32, i32
  }
  func.func @transform_7(%arg0: i32) -> (i32, i32) {
    %c0_i32 = arith.constant 0 : i32
    %c0_i32_0 = arith.constant 0 : i32
    %c0_i32_1 = arith.constant 0 : i32
    return %c0_i32, %c0_i32_0 : i32, i32
  }
  func.func @transform_8(%arg0: i32) -> (i32, i32) {
    %c0_i32 = arith.constant 0 : i32
    %c0_i32_0 = arith.constant 0 : i32
    %c0_i32_1 = arith.constant 0 : i32
    return %c0_i32, %c0_i32_0 : i32, i32
  }
  func.func @transform_9(%arg0: i32) -> (i32, i32) {
    %c0_i32 = arith.constant 0 : i32
    %c0_i32_0 = arith.constant 0 : i32
    return %arg0, %c0_i32 : i32, i32
  }
}

</mosaic_0001>

<bundles_post_ra>
// kernel: urlcnn_forward.1
= control target key start
LH: loop header
LB: loop body
LE: loop exit
PB: predicated region body
PF: predicated region fallthrough
CT: control target
= control target key end

     0   :  { %14 = vsyncpa [#allocation3], 0  ;;  %s1682_s0 = inlined_call_operand.vmem [shape: f32[16,64], index: 0, kind: input, shape index: {}]   ;;  %s1683_s1 = inlined_call_operand.hbm [shape: bf16[64,512], index: 1, kind: input, shape index: {}]   ;;  %s1684_s2 = inlined_call_operand.vmem [shape: f32[1,512], index: 2, kind: input, shape index: {}]   ;;  %s1685_s3 = inlined_call_operand.hbm [shape: bf16[512,256], index: 3, kind: input, shape index: {}]   ;;  %s1686_s4 = inlined_call_operand.vmem [shape: f32[1,256], index: 4, kind: input, shape index: {}]   ;;  %s1687_s5 = inlined_call_operand.hbm [shape: bf16[256,128], index: 5, kind: input, shape index: {}]   ;;  %s1688_s6 = inlined_call_operand.vmem [shape: f32[1,128], index: 6, kind: input, shape index: {}]   ;;  %s1689_s7 = inlined_call_operand.hbm [shape: bf16[128,128], index: 7, kind: input, shape index: {}]   ;;  %s1690_s8 = inlined_call_operand.vmem [shape: f32[1,128], index: 8, kind: input, shape index: {}]   ;;  %s1691_s9 = inlined_call_operand.vmem [shape: bf16[16,128], index: 9, kind: output, shape index: {}]  }
   0x1   :  { %15 = vsyncpa [#allocation5], 0 }
   0x2   :  { %16 = vsyncpa [#allocation8], 0  ;;  %s1534_s30 = smov [#allocation4]   ;;  %s1440_s13 = scalar_lea.hbm %s1685_s3, 8192 }
   0x3   :  { %s38_s10 = sshll.u32 %s1534_s30, 4  ;;  %p1441_p0 = scmp.ne.s32.totalorder %s1685_s3, %s1440_s13  ;;  %s39_s10 = int_to_ptr.vmem [resolvable:$true] %s38_s10 }
   0x4   :  { %p1444_p1 = scmp.lt.u32.totalorder %s1440_s13, %s1685_s3 }
   0x6   :  { %p1446_p2 = pnand %p1444_p1, %p1441_p0 }
   0x8   :  { %1449 = shalt.err (!%p1446_p2)
}
   0x9   :  { %s1450_s18 = scalar_lea.vmem %s39_s10, 8192  ;;  %p1455_p4 = scmp.lt.s32.totalorder %s39_s10, %s39_s10 }
   0xa   :  { %p1451_p3 = scmp.ne.s32.totalorder %s39_s10, %s1450_s18  ;;  %p1456_p5 = scmp.lt.s32.totalorder %s1450_s18, %s1450_s18 }
   0xc   :  { %p1457_p6 = por %p1456_p5, %p1455_p4 }
   0xe   :  { %p1458_p7 = pnand %p1457_p6, %p1451_p3 }
  0x10   :  { %1461 = shalt.err (!%p1458_p7)
}
  0x11   :  { %s1535_s19 = smov 128   ;;  %s1536_s20 = smov 8  }
  0x12   :  { %44 = dma.hbm_to_vmem [thread:$0]  %s1685_s3, 8192, %s39_s10, [#allocation5], %s1535_s19, %s1535_s19, %s1536_s20  }
  0x13   :  { %s1537_s23 = smov [#allocation2]   ;;  %s1462_s27 = scalar_lea.hbm %s1683_s1, 2048 }
  0x14   :  { %s24_s24 = sshll.u32 %s1537_s23, 4  ;;  %p1463_p8 = scmp.ne.s32.totalorder %s1683_s1, %s1462_s27  ;;  %s25_s24 = int_to_ptr.vmem [resolvable:$true] %s24_s24 }
  0x15   :  { %p1466_p9 = scmp.lt.u32.totalorder %s1462_s27, %s1683_s1 }
  0x17   :  { %p1468_p10 = pnand %p1466_p9, %p1463_p8 }
  0x19   :  { %1471 = shalt.err (!%p1468_p10)
}
  0x1a   :  { %s1472_s12 = scalar_lea.vmem %s25_s24, 2048  ;;  %p1477_p12 = scmp.lt.s32.totalorder %s25_s24, %s25_s24 }
  0x1b   :  { %p1473_p11 = scmp.ne.s32.totalorder %s25_s24, %s1472_s12  ;;  %p1478_p13 = scmp.lt.s32.totalorder %s1472_s12, %s1472_s12 }
  0x1d   :  { %p1479_p0 = por %p1478_p13, %p1477_p12 }
  0x1f   :  { %p1480_p1 = pnand %p1479_p0, %p1473_p11 }
  0x21   :  { %1483 = shalt.err (!%p1480_p1)
}
  0x22   :  { %s1538_s3 = smov 256   ;;  %s1539_s10 = smov 16  }
  0x23   :  { %30 = dma.hbm_to_vmem [thread:$0]  %s1683_s1, 2048, %s25_s24, [#allocation3], %s1538_s3, %s1538_s3, %s1539_s10  }
  0x24   :  { %s1540_s15 = smov [#allocation6]   ;;  %s1484_s19 = scalar_lea.hbm %s1687_s5, 2048 }
  0x25   :  { %s52_s16 = sshll.u32 %s1540_s15, 4  ;;  %p1485_p2 = scmp.ne.s32.totalorder %s1687_s5, %s1484_s19  ;;  %s53_s16 = int_to_ptr.vmem [resolvable:$true] %s52_s16 }
  0x26   :  { %p1488_p3 = scmp.lt.u32.totalorder %s1484_s19, %s1687_s5 }
  0x28   :  { %p1490_p4 = pnand %p1488_p3, %p1485_p2 }
  0x2a   :  { %1493 = shalt.err (!%p1490_p4)
}
  0x2b   :  { %s1494_s25 = scalar_lea.vmem %s53_s16, 2048  ;;  %p1499_p6 = scmp.lt.s32.totalorder %s53_s16, %s53_s16 }
  0x2c   :  { %p1495_p5 = scmp.ne.s32.totalorder %s53_s16, %s1494_s25  ;;  %p1500_p7 = scmp.lt.s32.totalorder %s1494_s25, %s1494_s25 }
  0x2e   :  { %p1501_p8 = por %p1500_p7, %p1499_p6 }
  0x30   :  { %p1502_p9 = pnand %p1501_p8, %p1495_p5 }
  0x32   :  { %1505 = shalt.err (!%p1502_p9)
}
  0x33   :  { %s1541_s1 = smov 64   ;;  %s1542_s24 = smov 4  }
  0x34   :  { %58 = dma.hbm_to_vmem [thread:$0]  %s1687_s5, 2048, %s53_s16, [#allocation5], %s1541_s1, %s1541_s1, %s1542_s24  }
  0x35   :  { %s1543_s28 = smov [#allocation7]   ;;  %s1506_s12 = scalar_lea.hbm %s1689_s7, 1024 }
  0x36   :  { %s66_s29 = sshll.u32 %s1543_s28, 4  ;;  %p1507_p10 = scmp.ne.s32.totalorder %s1689_s7, %s1506_s12  ;;  %s67_s29 = int_to_ptr.vmem [resolvable:$true] %s66_s29 }
  0x37   :  { %p1510_p11 = scmp.lt.u32.totalorder %s1506_s12, %s1689_s7 }
  0x39   :  { %p1512_p12 = pnand %p1510_p11, %p1507_p10 }
  0x3b   :  { %1515 = shalt.err (!%p1512_p12)
}
  0x3c   :  { %s1516_s15 = scalar_lea.vmem %s67_s29, 1024  ;;  %p1521_p0 = scmp.lt.s32.totalorder %s67_s29, %s67_s29 }
  0x3d   :  { %p1517_p13 = scmp.ne.s32.totalorder %s67_s29, %s1516_s15  ;;  %p1522_p1 = scmp.lt.s32.totalorder %s1516_s15, %s1516_s15 }
  0x3f   :  { %p1523_p2 = por %p1522_p1, %p1521_p0 }
  0x41   :  { %p1524_p3 = pnand %p1523_p2, %p1517_p13 }
  0x43   :  { %1527 = shalt.err (!%p1524_p3)
}
  0x44   :  { %72 = dma.hbm_to_vmem [thread:$0]  %s1689_s7, 1024, %s67_s29, [#allocation8], %s1541_s1, %s1541_s1, %s1542_s24  }
  0x45   :  { %1528 = dma.done.wait [#allocation3], 2048  }
  0x46   :  { %1529 = vsyncadd [#allocation3], 4294965248 }
  0x47   :  { %1530 = dma.done.wait [#allocation5], 10240  }
  0x48   :  { %1531 = vsyncadd [#allocation5], 4294957056 }
  0x49   :  { %1532 = dma.done.wait [#allocation8], 1024  }
  0x4a   :  { %1533 = vsyncadd [#allocation8], 4294966272  ;;  %v1544_v0 = vmov 0   ;;  %v1296_v1 = vld [vmem:[#allocation2 + $0x4] ss:$16 sps:$4 sm:$0xff]   ;;  %v89_v10 = vld [vmem:[%s1682_s0 + $0x8] sm:$0xff] }
  0x4b   :  { %245 = vmatprep.mubr.bf16.mxu1 %v1544_v0  ;;  %v1298_v2 = vld [vmem:[#allocation2] ss:$16 sps:$4 sm:$0xff]   ;;  %213 = vmatprep.subr.bf16.mxu1 %v1296_v1  ;;  %v1299_v3 = vld [vmem:[#allocation2 + $0x24] ss:$16 sps:$4 sm:$0xff]   ;;  %v1310_v11 = vld [vmem:[#allocation2 + $0xc] ss:$16 sps:$4 sm:$0xff]  }
  0x4c   :  { %214 = vmatpush1.bf16.msra.mxu1 %v1298_v2  ;;  %v1301_v4 = vld [vmem:[#allocation2 + $0x20] ss:$16 sps:$4 sm:$0xff]   ;;  %v1302_v5 = vld [vmem:[#allocation2 + $0x44] ss:$16 sps:$4 sm:$0xff]   ;;  %vm209_vm0 = vcmask 523264   ;;  %v1418_v55 = vld [vmem:[#allocation6 + $0x48] sm:$0xff]  }
  0x4d   :  { %215 = vmatprep.subr.bf16.mxu1 %v1299_v3  ;;  %v1304_v6 = vld [vmem:[#allocation2 + $0x40] ss:$16 sps:$4 sm:$0xff]   ;;  %v1305_v7 = vld [vmem:[#allocation2 + $0x64] ss:$16 sps:$4 sm:$0xff]   ;;  %v1308_v16 = vld [vmem:[#allocation2 + $0x8] ss:$16 sps:$4 sm:$0xff]  }
  0x4e   :  { %v1307_v8 = vld [vmem:[#allocation2 + $0x60] ss:$16 sps:$4 sm:$0xff]   ;;  %v1320_v12 = vld [vmem:[#allocation4 + $0x4] ss:$8 sps:$4 sm:$0xff]   ;;  %v1323_v14 = vld [vmem:[#allocation4 + $0x14] ss:$8 sps:$4 sm:$0xff]  }
  0x4f   :  { %v88_v9 = vld [vmem:[%s1682_s0] sm:$0xff]  ;;  %707 = vmatprep.subr.bf16.mxu0 %v1320_v12  ;;  %v1313_v17 = vld [vmem:[#allocation2 + $0x2c] ss:$16 sps:$4 sm:$0xff]   ;;  %v1325_v18 = vld [vmem:[#allocation4 + $0x10] ss:$8 sps:$4 sm:$0xff]   ;;  %vm1546_vm1 = vmmov 0  }
  0x50   :  { %216 = vmatpush1.bf16.msra.mxu1 %v1301_v4  ;;  %v1322_v13 = vld [vmem:[#allocation4] ss:$8 sps:$4 sm:$0xff]   ;;  %v90_v15 = vpack.c.bf16 %v89_v10, %v88_v9  ;;  %v1326_v19 = vld [vmem:[#allocation4 + $0x24] ss:$8 sps:$4 sm:$0xff]   ;;  %v1329_v23 = vld [vmem:[#allocation4 + $0x34] ss:$8 sps:$4 sm:$0xff]  }
  0x51   :  { %217 = vmatprep.subr.bf16.mxu1 %v1302_v5  ;;  %708 = vmatpush1.bf16.msra.mxu0 %v1322_v13  ;;  %v1311_v20 = vld [vmem:[#allocation2 + $0x28] ss:$16 sps:$4 sm:$0xff]   ;;  %v1316_v21 = vld [vmem:[#allocation2 + $0x4c] ss:$16 sps:$4 sm:$0xff]   ;;  %v1416_v53 = vld [vmem:[#allocation6 + $0x40] sm:$0xff]  }
  0x52   :  { %709 = vmatprep.subr.bf16.mxu0 %v1323_v14  ;;  %v1328_v22 = vld [vmem:[#allocation4 + $0x20] ss:$8 sps:$4 sm:$0xff]   ;;  %v1319_v25 = vld [vmem:[#allocation2 + $0x6c] ss:$16 sps:$4 sm:$0xff]   ;;  %v1331_v26 = vld [vmem:[#allocation4 + $0x30] ss:$8 sps:$4 sm:$0xff]  }
  0x53   :  { %v1314_v24 = vld [vmem:[#allocation2 + $0x48] ss:$16 sps:$4 sm:$0xff]   ;;  %v1332_v27 = vld [vmem:[#allocation4 + $0x44] ss:$8 sps:$4 sm:$0xff]   ;;  %v1335_v30 = vld [vmem:[#allocation4 + $0x54] ss:$8 sps:$4 sm:$0xff]  }
  0x54   :  { %218 = vmatpush1.bf16.msra.mxu1 %v1304_v6  ;;  %v1317_v28 = vld [vmem:[#allocation2 + $0x68] ss:$16 sps:$4 sm:$0xff]   ;;  %v1338_v32 = vld [vmem:[#allocation4 + $0x64] ss:$8 sps:$4 sm:$0xff]   ;;  %v1341_v34 = vld [vmem:[#allocation4 + $0x74] ss:$8 sps:$4 sm:$0xff]  }
  0x55   :  { %219 = vmatprep.subr.bf16.mxu1 %v1305_v7  ;;  %710 = vmatpush1.bf16.msra.mxu0 %v1325_v18  ;;  %v1334_v29 = vld [vmem:[#allocation4 + $0x40] ss:$8 sps:$4 sm:$0xff]   ;;  %v1337_v31 = vld [vmem:[#allocation4 + $0x50] ss:$8 sps:$4 sm:$0xff]   ;;  %v1344_v36 = vld [vmem:[#allocation4 + $0x84] ss:$8 sps:$4 sm:$0xff]  }
  0x56   :  { %711 = vmatprep.subr.bf16.mxu0 %v1326_v19  ;;  %v1340_v33 = vld [vmem:[#allocation4 + $0x60] ss:$8 sps:$4 sm:$0xff]   ;;  %v1343_v35 = vld [vmem:[#allocation4 + $0x70] ss:$8 sps:$4 sm:$0xff]   ;;  %v1347_v38 = vld [vmem:[#allocation4 + $0x94] ss:$8 sps:$4 sm:$0xff]  }
  0x57   :  { %v1346_v37 = vld [vmem:[#allocation4 + $0x80] ss:$8 sps:$4 sm:$0xff]   ;;  %v1349_v39 = vld [vmem:[#allocation4 + $0x90] ss:$8 sps:$4 sm:$0xff]   ;;  %v1350_v40 = vld [vmem:[#allocation4 + $0xa4] ss:$8 sps:$4 sm:$0xff]  }
  0x58   :  { %220 = vmatpush1.bf16.msra.mxu1 %v1307_v8  ;;  %v1352_v41 = vld [vmem:[#allocation4 + $0xa0] ss:$8 sps:$4 sm:$0xff]   ;;  %v1353_v42 = vld [vmem:[#allocation4 + $0xb4] ss:$8 sps:$4 sm:$0xff]   ;;  %v1355_v43 = vld [vmem:[#allocation4 + $0xb0] ss:$8 sps:$4 sm:$0xff]  }
  0x59   :  { %256 = vmatprep.subr.bf16.mxu1 %v1310_v11  ;;  %712 = vmatpush1.bf16.msra.mxu0 %v1328_v22  ;;  %v1356_v44 = vld [vmem:[#allocation4 + $0xc4] ss:$8 sps:$4 sm:$0xff]   ;;  %v1358_v45 = vld [vmem:[#allocation4 + $0xc0] ss:$8 sps:$4 sm:$0xff]   ;;  %v1359_v46 = vld [vmem:[#allocation4 + $0xd4] ss:$8 sps:$4 sm:$0xff]  }
  0x5a   :  { %713 = vmatprep.subr.bf16.mxu0 %v1329_v23  ;;  %v1361_v47 = vld [vmem:[#allocation4 + $0xd0] ss:$8 sps:$4 sm:$0xff]   ;;  %v1362_v48 = vld [vmem:[#allocation4 + $0xe4] ss:$8 sps:$4 sm:$0xff]   ;;  %v1364_v49 = vld [vmem:[#allocation4 + $0xe0] ss:$8 sps:$4 sm:$0xff]  }
  0x5b   :  { %1123 = vmatmul.mubr.msk.bf16.vlgmr.msra.gmra.mrb[0].mxu1 %vm209_vm0, %v90_v15  ;;  %v1365_v50 = vld [vmem:[#allocation4 + $0xf4] ss:$8 sps:$4 sm:$0xff]   ;;  %v1367_v51 = vld [vmem:[#allocation4 + $0xf0] ss:$8 sps:$4 sm:$0xff]   ;;  %v1370_v52 = vld [vmem:[#allocation4 + $0x104] ss:$8 sps:$4 sm:$0xff]  }
  0x5c   :  { %257 = vmatpush1.bf16.msra.mxu1 %v1308_v16  ;;  %288 = vmatprep.mubr.bf16.mxu1 %v1544_v0  ;;  %v1417_v54 = vld [vmem:[#allocation6] sm:$0xff]   ;;  %v1419_v56 = vld [vmem:[#allocation6 + $0x8] sm:$0xff]   ;;  %v1420_v57 = vld [vmem:[#allocation6 + $0x50] sm:$0xff]   ;;  %v109_v0 = vlaneseq }
  0x5d   :  { %258 = vmatprep.subr.bf16.mxu1 %v1313_v17  ;;  %714 = vmatpush1.bf16.msra.mxu0 %v1331_v26  ;;  %v1421_v58 = vld [vmem:[#allocation6 + $0x10] sm:$0xff]   ;;  %v1422_v59 = vld [vmem:[#allocation6 + $0x58] sm:$0xff]   ;;  %v1424_v61 = vld [vmem:[#allocation6 + $0x60] sm:$0xff]  }
  0x5e   :  { %715 = vmatprep.subr.bf16.mxu0 %v1332_v27  ;;  %v1423_v60 = vld [vmem:[#allocation6 + $0x18] sm:$0xff]   ;;  %v1425_v62 = vld [vmem:[#allocation6 + $0x20] sm:$0xff]   ;;  %v1426_v63 = vld [vmem:[#allocation6 + $0x68] sm:$0xff]   ;;  %v1653_v1 = vshrl.u32 %v109_v0, 7 }
  0x5f   :  { %v107_v3 = vld [vmem:[%s1684_s2] sm:$0xf]  ;;  %v1373_v22 = vld [vmem:[#allocation4 + $0x114] ss:$8 sps:$4 sm:$0xff]   ;;  %v1376_v26 = vld [vmem:[#allocation4 + $0x124] ss:$8 sps:$4 sm:$0xff]  }
  0x60   :  { %259 = vmatpush1.bf16.msra.mxu1 %v1311_v20  ;;  %v111_v2 = vsub.s32 0, %v1653_v1  ;;  %v115_v4 = vsub.s32 1, %v1653_v1  ;;  %v119_v23 = vsub.s32 2, %v1653_v1  ;;  %v1409_v0 = vld [vmem:[#allocation4 + $0x1d4] ss:$8 sps:$4 sm:$0xff]  }
  0x61   :  { %260 = vmatprep.subr.bf16.mxu1 %v1316_v21  ;;  %716 = vmatpush1.bf16.msra.mxu0 %v1334_v29  ;;  %v1368_v21 = vld [vmem:[#allocation4 + $0x100] ss:$8 sps:$4 sm:$0xff]  }
  0x62   :  { %717 = vmatprep.subr.bf16.mxu0 %v1335_v30  ;;  %v112_v5 = vrot.slane %v107_v3, %v111_v2  ;;  %v116_v6 = vrot.slane %v107_v3, %v115_v4  ;;  %v120_v27 = vrot.slane %v107_v3, %v119_v23  ;;  %v1374_v29 = vld [vmem:[#allocation4 + $0x120] ss:$8 sps:$4 sm:$0xff]  }
  0x64   :  { %261 = vmatpush1.bf16.msra.mxu1 %v1314_v24  ;;  %v123_v24 = vsub.s32 3, %v1653_v1  ;;  %v1433_v1 = vld [vmem:[#allocation7 + $0x8] sm:$0xff]  }
  0x65   :  { %262 = vmatprep.subr.bf16.mxu1 %v1319_v25  ;;  %718 = vmatpush1.bf16.msra.mxu0 %v1337_v31  ;;  %v1371_v25 = vld [vmem:[#allocation4 + $0x110] ss:$8 sps:$4 sm:$0xff]   ;;  %v1379_v31 = vld [vmem:[#allocation4 + $0x134] ss:$8 sps:$4 sm:$0xff]  }
  0x66   :  { %719 = vmatprep.subr.bf16.mxu0 %v1338_v32 }
  0x68   :  { %263 = vmatpush1.bf16.msra.mxu1 %v1317_v28  ;;  %v124_v28 = vrot.slane %v107_v3, %v123_v24  ;;  %v1407_v3 = vld [vmem:[#allocation4 + $0x1d0] ss:$8 sps:$4 sm:$0xff]  }
  0x69   :  { %720 = vmatpush1.bf16.msra.mxu0 %v1340_v33  ;;  %1224 = vmatprep.subr.bf16.mxu1 %v1416_v53  ;;  %v1389_v53 = vld [vmem:[#allocation4 + $0x170] ss:$8 sps:$4 sm:$0xff]  }
  0x6a   :  { %721 = vmatprep.subr.bf16.mxu0 %v1341_v34 }
  0x6b   :  { %1124 = vmatmul.mubr.msk.bf16.vlgmr.msra.gmra.mrb[4].mxu1 %vm209_vm0, %v90_v15 }
  0x6c   :  { %1225 = vmatpush3.bf16.msra.mxu1 %v1417_v54  ;;  %v1394_v54 = vld [vmem:[#allocation4 + $0x184] ss:$8 sps:$4 sm:$0xff]  }
  0x6d   :  { %722 = vmatpush1.bf16.msra.mxu0 %v1343_v35  ;;  %1226 = vmatprep.subr.bf16.mxu1 %v1418_v55  ;;  %v1392_v55 = vld [vmem:[#allocation4 + $0x180] ss:$8 sps:$4 sm:$0xff]  }
  0x6e   :  { %723 = vmatprep.subr.bf16.mxu0 %v1344_v36 }
  0x70   :  { %1227 = vmatpush3.bf16.msra.mxu1 %v1419_v56  ;;  %v1397_v56 = vld [vmem:[#allocation4 + $0x194] ss:$8 sps:$4 sm:$0xff]  }
  0x71   :  { %724 = vmatpush1.bf16.msra.mxu0 %v1346_v37  ;;  %1228 = vmatprep.subr.bf16.mxu1 %v1420_v57  ;;  %v1395_v57 = vld [vmem:[#allocation4 + $0x190] ss:$8 sps:$4 sm:$0xff]  }
  0x72   :  { %725 = vmatprep.subr.bf16.mxu0 %v1347_v38 }
  0x74   :  { %1229 = vmatpush3.bf16.msra.mxu1 %v1421_v58  ;;  %v1400_v58 = vld [vmem:[#allocation4 + $0x1a4] ss:$8 sps:$4 sm:$0xff]  }
  0x75   :  { %726 = vmatpush1.bf16.msra.mxu0 %v1349_v39  ;;  %1230 = vmatprep.subr.bf16.mxu1 %v1422_v59  ;;  %v1377_v39 = vld [vmem:[#allocation4 + $0x130] ss:$8 sps:$4 sm:$0xff]   ;;  %v1398_v59 = vld [vmem:[#allocation4 + $0x1a0] ss:$8 sps:$4 sm:$0xff]  }
  0x76   :  { %727 = vmatprep.subr.bf16.mxu0 %v1350_v40 }
  0x78   :  { %1231 = vmatpush3.bf16.msra.mxu1 %v1423_v60  ;;  %v1403_v60 = vld [vmem:[#allocation4 + $0x1b4] ss:$8 sps:$4 sm:$0xff]  }
  0x79   :  { %728 = vmatpush1.bf16.msra.mxu0 %v1352_v41  ;;  %1232 = vmatprep.subr.bf16.mxu1 %v1424_v61  ;;  %v1401_v61 = vld [vmem:[#allocation4 + $0x1b0] ss:$8 sps:$4 sm:$0xff]  }
  0x7a   :  { %729 = vmatprep.subr.bf16.mxu0 %v1353_v42  ;;  %v1382_v42 = vld [vmem:[#allocation4 + $0x144] ss:$8 sps:$4 sm:$0xff]  }
  0x7c   :  { %1233 = vmatpush3.bf16.msra.mxu1 %v1425_v62  ;;  %v1406_v62 = vld [vmem:[#allocation4 + $0x1c4] ss:$8 sps:$4 sm:$0xff]  }
  0x7d   :  { %730 = vmatpush1.bf16.msra.mxu0 %v1355_v43  ;;  %1234 = vmatprep.subr.bf16.mxu1 %v1426_v63  ;;  %v1404_v63 = vld [vmem:[#allocation4 + $0x1c0] ss:$8 sps:$4 sm:$0xff]  }
  0x7e   :  { %731 = vmatprep.subr.bf16.mxu0 %v1356_v44 }
  0x81   :  { %732 = vmatpush1.bf16.msra.mxu0 %v1358_v45 }
  0x82   :  { %733 = vmatprep.subr.bf16.mxu0 %v1359_v46  ;;  %v1380_v46 = vld [vmem:[#allocation4 + $0x140] ss:$8 sps:$4 sm:$0xff]  }
  0x85   :  { %734 = vmatpush1.bf16.msra.mxu0 %v1361_v47 }
  0x86   :  { %735 = vmatprep.subr.bf16.mxu0 %v1362_v48  ;;  %v1385_v48 = vld [vmem:[#allocation4 + $0x154] ss:$8 sps:$4 sm:$0xff]  }
  0x89   :  { %736 = vmatpush1.bf16.msra.mxu0 %v1364_v49  ;;  %v1383_v49 = vld [vmem:[#allocation4 + $0x150] ss:$8 sps:$4 sm:$0xff]  }
  0x8a   :  { %737 = vmatprep.subr.bf16.mxu0 %v1365_v50  ;;  %v1388_v50 = vld [vmem:[#allocation4 + $0x164] ss:$8 sps:$4 sm:$0xff]  }
  0x8d   :  { %738 = vmatpush1.bf16.msra.mxu0 %v1367_v51  ;;  %v1386_v51 = vld [vmem:[#allocation4 + $0x160] ss:$8 sps:$4 sm:$0xff]  }
  0x8e   :  { %750 = vmatprep.subr.bf16.mxu0 %v1370_v52  ;;  %v1391_v52 = vld [vmem:[#allocation4 + $0x174] ss:$8 sps:$4 sm:$0xff]  }
 0x12e   :  { %v247_v7 = vpop.f32.mrb[0].mxu1 }
 0x12f   :  { %v248_v8 = vadd.f32 %v247_v7, %v112_v5  ;;  %v249_v9 = vpop.f32.mrb[1].mxu1  ;;  %v1415_v7 = vld [vmem:[#allocation4 + $0x1f4] ss:$8 sps:$4 sm:$0xff]  }
 0x130   :  { %v250_v10 = vadd.f32 %v249_v9, %v116_v6  ;;  %v251_v11 = vpop.f32.mrb[2].mxu1  ;;  %v1427_v9 = vld [vmem:[#allocation6 + $0x28] sm:$0xff]  }
 0x131   :  { %v252_v12 = vadd.f32 %v251_v11, %v112_v5  ;;  %v253_v13 = vpop.f32.mrb[3].mxu1  ;;  %v299_v15 = vmax.f32 %v248_v8, 0.0  ;;  %v1412_v5 = vld [vmem:[#allocation4 + $0x1e4] ss:$8 sps:$4 sm:$0xff]   ;;  %v1413_v8 = vld [vmem:[#allocation4 + $0x1f0] ss:$8 sps:$4 sm:$0xff]   ;;  %1235 = vmatpush3.bf16.msra.mxu1 %v1427_v9 }
 0x132   :  { %v254_v14 = vadd.f32 %v253_v13, %v116_v6  ;;  %v300_v17 = vmax.f32 %v250_v10, 0.0  ;;  %v1410_v6 = vld [vmem:[#allocation4 + $0x1e0] ss:$8 sps:$4 sm:$0xff]   ;;  %v1428_v10 = vld [vmem:[#allocation6 + $0x70] sm:$0xff]   ;;  %v1431_v13 = vld [vmem:[#allocation6 + $0x38] sm:$0xff]  }
 0x133   :  { %v303_v16 = vmax.f32 %v252_v12, 0.0  ;;  %v1429_v11 = vld [vmem:[#allocation6 + $0x30] sm:$0xff]   ;;  %1236 = vmatprep.subr.bf16.mxu1 %v1428_v10  ;;  %v1430_v12 = vld [vmem:[#allocation6 + $0x78] sm:$0xff]  }
 0x134   :  { %v304_v18 = vmax.f32 %v254_v14, 0.0  ;;  %v1545_v14 = vmov 0.0  }
 0x135   :  { %v307_v19 = vpack.c.bf16 %v303_v16, %v299_v15  ;;  %1237 = vmatpush3.bf16.msra.mxu1 %v1429_v11  ;;  %v375_v15 = vld [vmem:[%s1686_s4] sm:$0x3] }
 0x136   :  { %v308_v20 = vpack.c.bf16 %v304_v18, %v300_v17  ;;  %1238 = vmatprep.subr.bf16.mxu1 %v1430_v12  ;;  %v380_v16 = vrot.slane %v375_v15, %v111_v2  ;;  %v384_v17 = vrot.slane %v375_v15, %v115_v4  ;;  %v1434_v2 = vld [vmem:[#allocation7 + $0x10] sm:$0xff]   ;;  %v1435_v4 = vld [vmem:[#allocation7 + $0x18] sm:$0xff]  }
 0x138   :  { %739 = vmatprep.mubr.bf16.mxu0 %v308_v20 }
 0x139   :  { %740 = vmatmul.mubr.bf16.vlgmr.msra.gmra.mrb[0].mxu0 %v307_v19  ;;  %1239 = vmatpush3.bf16.msra.mxu1 %v1431_v13 }
 0x13a   :  { %751 = vmatpush1.bf16.msra.mxu0 %v1368_v21  ;;  %1255 = vmatprep.subr.bf16.mxu1 %v1545_v14 }
 0x13b   :  { %752 = vmatprep.subr.bf16.mxu0 %v1373_v22 }
 0x13e   :  { %753 = vmatpush1.bf16.msra.mxu0 %v1371_v25  ;;  %v290_v30 = vpop.f32.mrb[4].mxu1 }
 0x13f   :  { %754 = vmatprep.subr.bf16.mxu0 %v1376_v26  ;;  %v291_v32 = vadd.f32 %v290_v30, %v120_v27  ;;  %v292_v33 = vpop.f32.mrb[5].mxu1 }
 0x140   :  { %v293_v34 = vadd.f32 %v292_v33, %v124_v28  ;;  %v294_v35 = vpop.f32.mrb[6].mxu1  ;;  %v1436_v33 = vld [vmem:[#allocation7 + $0x20] sm:$0xff]  }
 0x141   :  { %v301_v36 = vmax.f32 %v291_v32, 0.0  ;;  %v295_v37 = vadd.f32 %v294_v35, %v120_v27  ;;  %v296_v38 = vpop.f32.mrb[7].mxu1  ;;  %v1432_v32 = vld [vmem:[#allocation7] sm:$0xff]   ;;  %v1438_v35 = vld [vmem:[#allocation7 + $0x30] sm:$0xff]  }
 0x142   :  { %755 = vmatpush1.bf16.msra.mxu0 %v1374_v29  ;;  %v302_v40 = vmax.f32 %v293_v34, 0.0  ;;  %v297_v41 = vadd.f32 %v296_v38, %v124_v28  ;;  %v1437_v34 = vld [vmem:[#allocation7 + $0x28] sm:$0xff]   ;;  %v1189_v38 = vld [vmem:[%s1688_s6] ss:$0 sm:$0xff] }
 0x143   :  { %756 = vmatprep.subr.bf16.mxu0 %v1379_v31  ;;  %v305_v43 = vmax.f32 %v295_v37, 0.0 }
 0x144   :  { %v306_v44 = vmax.f32 %v297_v41, 0.0 }
 0x145   :  { %v309_v45 = vpack.c.bf16 %v305_v43, %v301_v36  ;;  %v1439_v36 = vld [vmem:[#allocation7 + $0x38] sm:$0xff]  }
 0x146   :  { %757 = vmatpush1.bf16.msra.mxu0 %v1377_v39  ;;  %v310_v47 = vpack.c.bf16 %v306_v44, %v302_v40 }
 0x147   :  { %758 = vmatprep.subr.bf16.mxu0 %v1382_v42 }
 0x148   :  { %782 = vmatprep.mubr.bf16.mxu0 %v310_v47 }
 0x14a   :  { %759 = vmatpush1.bf16.msra.mxu0 %v1380_v46 }
 0x14b   :  { %760 = vmatprep.subr.bf16.mxu0 %v1385_v48 }
 0x14e   :  { %761 = vmatpush1.bf16.msra.mxu0 %v1383_v49  ;;  %v1206_v49 = vld [vmem:[%s1690_s8] ss:$0 sm:$0xff] }
 0x14f   :  { %762 = vmatprep.subr.bf16.mxu0 %v1388_v50 }
 0x152   :  { %763 = vmatpush1.bf16.msra.mxu0 %v1386_v51 }
 0x153   :  { %764 = vmatprep.subr.bf16.mxu0 %v1391_v52 }
 0x156   :  { %765 = vmatpush1.bf16.msra.mxu0 %v1389_v53 }
 0x157   :  { %766 = vmatprep.subr.bf16.mxu0 %v1394_v54 }
 0x15a   :  { %767 = vmatpush1.bf16.msra.mxu0 %v1392_v55 }
 0x15b   :  { %768 = vmatprep.subr.bf16.mxu0 %v1397_v56 }
 0x15e   :  { %769 = vmatpush1.bf16.msra.mxu0 %v1395_v57 }
 0x15f   :  { %770 = vmatprep.subr.bf16.mxu0 %v1400_v58 }
 0x162   :  { %771 = vmatpush1.bf16.msra.mxu0 %v1398_v59 }
 0x163   :  { %772 = vmatprep.subr.bf16.mxu0 %v1403_v60 }
 0x166   :  { %773 = vmatpush1.bf16.msra.mxu0 %v1401_v61 }
 0x167   :  { %774 = vmatprep.subr.bf16.mxu0 %v1406_v62 }
 0x16a   :  { %775 = vmatpush1.bf16.msra.mxu0 %v1404_v63 }
 0x16b   :  { %776 = vmatprep.subr.bf16.mxu0 %v1409_v0 }
 0x16e   :  { %777 = vmatpush1.bf16.msra.mxu0 %v1407_v3 }
 0x16f   :  { %778 = vmatprep.subr.bf16.mxu0 %v1412_v5 }
 0x172   :  { %779 = vmatpush1.bf16.msra.mxu0 %v1410_v6 }
 0x173   :  { %780 = vmatprep.subr.bf16.mxu0 %v1415_v7 }
 0x176   :  { %781 = vmatpush1.bf16.msra.mxu0 %v1413_v8 }
 0x179   :  { %783 = vmatmul.mubr.bf16.vlgmr.msra.gmra.mrb[0].mxu0 %v309_v45 }
 0x24c   :  { %v784_v18 = vpop.f32.mrb[0].mxu0 }
 0x24d   :  { %v1275_v19 = vadd.f32 %v784_v18, %v380_v16  ;;  %v786_v20 = vpop.f32.mrb[1].mxu0 }
 0x24e   :  { %v1276_v21 = vadd.f32 %v786_v20, %v384_v17  ;;  %v788_v22 = vpop.f32.mrb[2].mxu0 }
 0x24f   :  { %v1277_v23 = vadd.f32 %v788_v22, %v380_v16  ;;  %v790_v24 = vpop.f32.mrb[3].mxu0  ;;  %v793_v26 = vmax.f32 %v1275_v19, 0.0 }
 0x250   :  { %v1278_v25 = vadd.f32 %v790_v24, %v384_v17  ;;  %v794_v28 = vmax.f32 %v1276_v21, 0.0 }
 0x251   :  { %v795_v27 = vmax.f32 %v1277_v23, 0.0 }
 0x252   :  { %v796_v29 = vmax.f32 %v1278_v25, 0.0 }
 0x253   :  { %v797_v30 = vpack.c.bf16 %v795_v27, %v793_v26 }
 0x254   :  { %v798_v31 = vpack.c.bf16 %v796_v29, %v794_v28 }
 0x256   :  { %966 = vmatprep.mubr.bf16.mxu1 %v798_v31 }
 0x257   :  { %967 = vmatmul.mubr.bf16.vlgmr.msra.gmra.mrb[8].mxu1 %v797_v30 }
 0x258   :  { %1256 = vmatpush3.bf16.msra.mxu1 %v1432_v32  ;;  %1271 = vmatprep.mubr.msk.bf16.mxu1 %vm1546_vm1, %v1545_v14 }
 0x259   :  { %1257 = vmatprep.subr.bf16.mxu1 %v1545_v14 }
 0x25c   :  { %1258 = vmatpush3.bf16.msra.mxu1 %v1433_v1 }
 0x25d   :  { %1259 = vmatprep.subr.bf16.mxu1 %v1545_v14 }
 0x260   :  { %1260 = vmatpush3.bf16.msra.mxu1 %v1434_v2 }
 0x261   :  { %1261 = vmatprep.subr.bf16.mxu1 %v1545_v14 }
 0x264   :  { %1262 = vmatpush3.bf16.msra.mxu1 %v1435_v4 }
 0x265   :  { %1263 = vmatprep.subr.bf16.mxu1 %v1545_v14 }
 0x268   :  { %1264 = vmatpush3.bf16.msra.mxu1 %v1436_v33 }
 0x269   :  { %1265 = vmatprep.subr.bf16.mxu1 %v1545_v14 }
 0x26c   :  { %1266 = vmatpush3.bf16.msra.mxu1 %v1437_v34 }
 0x26d   :  { %1267 = vmatprep.subr.bf16.mxu1 %v1545_v14 }
 0x270   :  { %1268 = vmatpush3.bf16.msra.mxu1 %v1438_v35 }
 0x271   :  { %1269 = vmatprep.subr.bf16.mxu1 %v1545_v14 }
 0x274   :  { %1270 = vmatpush3.bf16.msra.mxu1 %v1439_v36 }
 0x32a   :  { %v1240_v37 = vpop.f32.mrb[8].mxu1 }
 0x32b   :  { %v1241_v39 = vpop.f32.mrb[9].mxu1 }
 0x32c   :  { %v1242_v40 = vadd.f32 %v1241_v39, %v1240_v37  ;;  %v1243_v41 = vpop.f32.mrb[10].mxu1 }
 0x32d   :  { %v1244_v42 = vpop.f32.mrb[11].mxu1 }
 0x32e   :  { %v969_v43 = vadd.f32 %v1242_v40, %v1189_v38  ;;  %v1245_v44 = vadd.f32 %v1244_v42, %v1243_v41 }
 0x330   :  { %v972_v45 = vadd.f32 %v1245_v44, %v1189_v38  ;;  %v975_v46 = vmax.f32 %v969_v43, 0.0 }
 0x332   :  { %v976_v47 = vmax.f32 %v972_v45, 0.0 }
 0x334   :  { %v977_v48 = vpack.c.bf16 %v976_v47, %v975_v46 }
 0x336   :  { %1272 = vmatmul.mubr.bf16.vlgmr.msra.gmra.mrb[12].mxu1 %v977_v48 }
 0x409   :  { %v1083_v50 = vpop.f32.mrb[12].mxu1 }
 0x40a   :  { %v1273_v51 = vpop.f32.mrb[13].mxu1  ;;  %v1084_v53 = vadd.f32 %v1206_v49, %v1083_v50 }
 0x40b   :  { %v1086_v52 = vpop.f32.mrb[14].mxu1 }
 0x40c   :  { %v1087_v54 = vadd.f32 %v1206_v49, %v1086_v52  ;;  %v1274_v55 = vpop.f32.mrb[15].mxu1 }
 0x40e   :  { %v1222_v56 = vpack.c.bf16 %v1087_v54, %v1084_v53 }
 0x410   :  { %1223 = vst [vmem:[%s1691_s9] sm:$0xff] %v1222_v56  }
 0x411   :  { %1104 = vsyncpa [#allocation3], 1 }
 0x412   :  { %1105 = vsyncpa [#allocation5], 1 }
 0x413   :  { %1106 = vsyncpa [#allocation8], 1 }

</bundles_post_ra>
